<compile_context>
chip_gen: v7x
topology: tpu7x:2x2x1
jax: 0.10.0
libtpu: 0.0.40
codegen_flags: <defaults>
</compile_context>

<pallas_src>
import math

import jax
import jax.numpy as jnp
from jax.experimental import pallas as pl
from jax.experimental.pallas import tpu as pltpu

S = 16   # sequence length
D = 32   # model dim


def _attn_kernel(q_ref, k_ref, wq_ref, bq_ref, wkv_ref, bkv_ref, o_ref):
    # q_ref, k_ref: (TB, S, D)
    # wq_ref:  (D, D)   = Wq^T * 1/sqrt(D)      bq_ref:  (1, D)  = bq * 1/sqrt(D)
    # wkv_ref: (D, 2D)  = [Wk^T | Wv^T]          bkv_ref: (1, 2D) = [bk | bv]
    # o_ref:   (TB, S, D)
    tb = q_ref.shape[0]

    q2d = q_ref[...].reshape(tb * S, D)
    k2d = k_ref[...].reshape(tb * S, D)

    # Query projection (scale already folded into the weights/bias).
    pq = (jnp.dot(q2d, wq_ref[...], preferred_element_type=jnp.float32)
          + bq_ref[...]).reshape(tb, S, D)

    # Fused key+value projection: one matmul against the resident (D, 2D) weight.
    kv = (jnp.dot(k2d, wkv_ref[...], preferred_element_type=jnp.float32)
          + bkv_ref[...]).reshape(tb, S, 2 * D)
    pk = kv[:, :, 0:D]
    pv = kv[:, :, D:2 * D]

    # Scores: contract the last dims directly (no explicit pk transpose).
    scores = jnp.einsum('bqd,bkd->bqk', pq, pk,
                        preferred_element_type=jnp.float32)       # (TB, S, S)

    # Numerically stable softmax; normalization folded after the PV matmul.
    m = jnp.max(scores, axis=-1, keepdims=True)
    e = jnp.exp(scores - m)
    s = jnp.sum(e, axis=-1, keepdims=True)

    attn = jnp.einsum('bqk,bkd->bqd', e, pv,
                      preferred_element_type=jnp.float32)         # (TB, S, D)
    o_ref[...] = attn * pl.reciprocal(s, approx=False)


def pack_params(wq, bq, wk, bk, wv, bv):
    """Pack raw Linear weights for the kernel.

    Returns (wq_t_scaled (D,D), bq_scaled (1,D), wkv_t (D,2D), bkv (1,2D)).
    The 1/sqrt(D) attention-score scale is folded into the query projection."""
    scale = 1.0 / math.sqrt(D)
    wq_t = (wq.T * scale).astype(jnp.float32)                 # (D, D)
    bq_s = (bq * scale).reshape(1, D).astype(jnp.float32)     # (1, D)
    wkv_t = jnp.concatenate([wk.T, wv.T], axis=1).astype(jnp.float32)   # (D, 2D)
    bkv = jnp.concatenate([bk, bv], axis=0).reshape(1, 2 * D).astype(jnp.float32)
    return wq_t, bq_s, wkv_t, bkv


def _pick_tb(B):
    for tb in (256, 128, 64, 32, 16, 8, 4, 2, 1):
        if B % tb == 0:
            return tb
    return 1


def model_forward(keys, query, fused_params):
    """keys, query: (B, S, D) float32. Returns (B, S, D) float32."""
    wq_t, bq_s, wkv_t, bkv = fused_params
    B = query.shape[0]
    TB = _pick_tb(B)

    return pl.pallas_call(
        _attn_kernel,
        out_shape=jax.ShapeDtypeStruct((B, S, D), jnp.float32),
        grid=(B // TB,),
        in_specs=[
            pl.BlockSpec((TB, S, D), lambda i: (i, 0, 0)),     # query block
            pl.BlockSpec((TB, S, D), lambda i: (i, 0, 0)),     # keys block
            pl.BlockSpec((D, D), lambda i: (0, 0)),            # Wq^T (scaled, resident)
            pl.BlockSpec((1, D), lambda i: (0, 0)),            # bq (scaled, resident)
            pl.BlockSpec((D, 2 * D), lambda i: (0, 0)),        # [Wk^T | Wv^T] (resident)
            pl.BlockSpec((1, 2 * D), lambda i: (0, 0)),        # [bk | bv] (resident)
        ],
        out_specs=pl.BlockSpec((TB, S, D), lambda i: (i, 0, 0)),
        compiler_params=pltpu.CompilerParams(
            dimension_semantics=("parallel",)),                # v7x: 2 TCs split batch
    )(query, keys, wq_t, bq_s, wkv_t, bkv)


def init_raw_params(key):
    """Deterministic init mimicking torch.nn.Linear defaults
    (uniform(-1/sqrt(fan_in), 1/sqrt(fan_in)))."""
    ks = jax.random.split(key, 6)
    bound = 1.0 / math.sqrt(D)
    u = lambda k, shape: jax.random.uniform(k, shape, jnp.float32, -bound, bound)
    wq = u(ks[0], (D, D)); bq = u(ks[1], (D,))
    wk = u(ks[2], (D, D)); bk = u(ks[3], (D,))
    wv = u(ks[4], (D, D)); bv = u(ks[5], (D,))
    return wq, bq, wk, bk, wv, bv


def reference_forward(keys, query, raw):
    """Pure-JAX reference of the PyTorch forward (f32 throughout)."""
    wq, bq, wk, bk, wv, bv = raw
    pq = query @ wq.T + bq
    pk = keys @ wk.T + bk
    pv = keys @ wv.T + bv
    scores = (pq @ jnp.swapaxes(pk, -2, -1)) / math.sqrt(D)
    p = jax.nn.softmax(scores, axis=-1)
    return p @ pv


if __name__ == "__main__":
    root = jax.random.PRNGKey(0)
    k_keys, k_query, k_params = jax.random.split(root, 3)

    keys_arr = jax.random.normal(k_keys, (1, S, D), jnp.float32)
    query_arr = jax.random.normal(k_query, (1, S, D), jnp.float32)

    raw_params = init_raw_params(k_params)
    fused_params = pack_params(*raw_params)

    out = model_forward(keys_arr, query_arr, fused_params)
    jax.block_until_ready(out)

    # sanity: shape / dtype / finite / matches pure-JAX reference
    assert out.shape == (1, S, D) and out.dtype == jnp.float32
    assert bool(jnp.all(jnp.isfinite(out)))
    ref = reference_forward(keys_arr, query_arr, raw_params)
    assert bool(jnp.allclose(out, ref, atol=1e-3, rtol=1e-3)), \
        float(jnp.max(jnp.abs(out - ref)))

    print("KERNEL_OK")
</pallas_src>

<mosaic_0001>
module attributes {stable_mosaic.version = 11 : i64} {
  func.func @_attn_kernel(%arg0: i32, %arg1: memref<1x16x32xf32, #tpu.memory_space<vmem>>, %arg2: memref<1x16x32xf32, #tpu.memory_space<vmem>>, %arg3: memref<32x32xf32, #tpu.memory_space<vmem>>, %arg4: memref<1x32xf32, #tpu.memory_space<vmem>>, %arg5: memref<32x64xf32, #tpu.memory_space<vmem>>, %arg6: memref<1x64xf32, #tpu.memory_space<vmem>>, %arg7: memref<1x16x32xf32, #tpu.memory_space<vmem>>) attributes {dimension_semantics = [#tpu.dimension_semantics<parallel>], iteration_bounds = array<i64: 1>, scalar_prefetch = 0 : i64, scratch_operands = 0 : i64, tpu.core_type = #tpu.core_type<tc>, window_params = [{transform_indices = @transform_0, window_bounds = array<i64: 1, 16, 32>}, {transform_indices = @transform_1, window_bounds = array<i64: 1, 16, 32>}, {pipeline_mode = #tpu.pipeline_mode<synchronous>, transform_indices = @transform_2, window_bounds = array<i64: 32, 32>}, {pipeline_mode = #tpu.pipeline_mode<synchronous>, transform_indices = @transform_3, window_bounds = array<i64: 1, 32>}, {pipeline_mode = #tpu.pipeline_mode<synchronous>, transform_indices = @transform_4, window_bounds = array<i64: 32, 64>}, {pipeline_mode = #tpu.pipeline_mode<synchronous>, transform_indices = @transform_5, window_bounds = array<i64: 1, 64>}, {transform_indices = @transform_6, window_bounds = array<i64: 1, 16, 32>}]} {
    %c0 = arith.constant 0 : index
    %c0_0 = arith.constant 0 : index
    %c0_1 = arith.constant 0 : index
    %0 = vector.load %arg1[%c0, %c0_0, %c0_1] : memref<1x16x32xf32, #tpu.memory_space<vmem>>, vector<1x16x32xf32>
    %1 = vector.shape_cast %0 : vector<1x16x32xf32> to vector<16x32xf32>
    %c0_2 = arith.constant 0 : index
    %c0_3 = arith.constant 0 : index
    %c0_4 = arith.constant 0 : index
    %2 = vector.load %arg2[%c0_2, %c0_3, %c0_4] : memref<1x16x32xf32, #tpu.memory_space<vmem>>, vector<1x16x32xf32>
    %3 = vector.shape_cast %2 : vector<1x16x32xf32> to vector<16x32xf32>
    %c0_5 = arith.constant 0 : index
    %c0_6 = arith.constant 0 : index
    %4 = vector.load %arg3[%c0_5, %c0_6] : memref<32x32xf32, #tpu.memory_space<vmem>>, vector<32x32xf32>
    %cst = arith.constant dense<0.000000e+00> : vector<16x32xf32>
    %5 = tpu.matmul %1, %4, %cst {dimension_numbers = #tpu.dot_dimension_numbers<[1], [0], [0], [1], [0, 0, 1, 1], [], []>} : vector<16x32xf32>, vector<32x32xf32>, vector<16x32xf32> -> vector<16x32xf32>
    %c0_7 = arith.constant 0 : index
    %c0_8 = arith.constant 0 : index
    %6 = vector.load %arg4[%c0_7, %c0_8] : memref<1x32xf32, #tpu.memory_space<vmem>>, vector<1x32xf32>
    %7 = vector.broadcast %6 : vector<1x32xf32> to vector<16x32xf32>
    %8 = arith.addf %5, %7 : vector<16x32xf32>
    %9 = vector.shape_cast %8 : vector<16x32xf32> to vector<1x16x32xf32>
    %c0_9 = arith.constant 0 : index
    %c0_10 = arith.constant 0 : index
    %10 = vector.load %arg5[%c0_9, %c0_10] : memref<32x64xf32, #tpu.memory_space<vmem>>, vector<32x64xf32>
    %cst_11 = arith.constant dense<0.000000e+00> : vector<16x64xf32>
    %11 = tpu.matmul %3, %10, %cst_11 {dimension_numbers = #tpu.dot_dimension_numbers<[1], [0], [0], [1], [0, 0, 1, 1], [], []>} : vector<16x32xf32>, vector<32x64xf32>, vector<16x64xf32> -> vector<16x64xf32>
    %c0_12 = arith.constant 0 : index
    %c0_13 = arith.constant 0 : index
    %12 = vector.load %arg6[%c0_12, %c0_13] : memref<1x64xf32, #tpu.memory_space<vmem>>, vector<1x64xf32>
    %13 = vector.broadcast %12 : vector<1x64xf32> to vector<16x64xf32>
    %14 = arith.addf %11, %13 : vector<16x64xf32>
    %15 = vector.shape_cast %14 : vector<16x64xf32> to vector<1x16x64xf32>
    %16 = vector.extract_strided_slice %15 {offsets = [0, 0, 0], sizes = [1, 16, 32], strides = [1, 1, 1]} : vector<1x16x64xf32> to vector<1x16x32xf32>
    %17 = vector.extract_strided_slice %15 {offsets = [0, 0, 32], sizes = [1, 16, 32], strides = [1, 1, 1]} : vector<1x16x64xf32> to vector<1x16x32xf32>
    "tpu.trace_start"() <{level = 10 : i32, message = "bqd,bkd->bqk"}> : () -> ()
    %cst_14 = arith.constant dense<0.000000e+00> : vector<1x16x16xf32>
    %18 = tpu.matmul %9, %16, %cst_14 {dimension_numbers = #tpu.dot_dimension_numbers<[2], [2], [1], [1], [0, 0, 0, 1, 1, 1], [0], [0]>} : vector<1x16x32xf32>, vector<1x16x32xf32>, vector<1x16x16xf32> -> vector<1x16x16xf32>
    "tpu.trace_stop"() : () -> ()
    %cst_15 = arith.constant dense<0xFF800000> : vector<1x16xf32>
    %19 = vector.multi_reduction <maximumf>, %18, %cst_15 [2] : vector<1x16x16xf32> to vector<1x16xf32>
    %20 = vector.shape_cast %19 : vector<1x16xf32> to vector<1x16x1xf32>
    %21 = vector.broadcast %20 : vector<1x16x1xf32> to vector<1x16x16xf32>
    %22 = arith.subf %18, %21 : vector<1x16x16xf32>
    %23 = math.exp %22 : vector<1x16x16xf32>
    %cst_16 = arith.constant dense<0.000000e+00> : vector<1x16xf32>
    %24 = vector.multi_reduction <add>, %23, %cst_16 [2] : vector<1x16x16xf32> to vector<1x16xf32>
    %25 = vector.shape_cast %24 : vector<1x16xf32> to vector<1x16x1xf32>
    "tpu.trace_start"() <{level = 10 : i32, message = "bqk,bkd->bqd"}> : () -> ()
    %cst_17 = arith.constant dense<0.000000e+00> : vector<1x16x32xf32>
    %26 = tpu.matmul %23, %17, %cst_17 {dimension_numbers = #tpu.dot_dimension_numbers<[2], [1], [1], [2], [0, 0, 0, 1, 1, 2], [0], [0]>} : vector<1x16x16xf32>, vector<1x16x32xf32>, vector<1x16x32xf32> -> vector<1x16x32xf32>
    "tpu.trace_stop"() : () -> ()
    %27 = tpu.reciprocal %25 : vector<1x16x1xf32> -> vector<1x16x1xf32>
    %28 = vector.broadcast %27 : vector<1x16x1xf32> to vector<1x16x32xf32>
    %29 = arith.mulf %26, %28 : vector<1x16x32xf32>
    %c0_18 = arith.constant 0 : index
    %c0_19 = arith.constant 0 : index
    %c0_20 = arith.constant 0 : index
    %30 = vector.load %arg7[%c0_18, %c0_19, %c0_20] : memref<1x16x32xf32, #tpu.memory_space<vmem>>, vector<1x16x32xf32>
    tpu.vector_store %arg7[%c0_18, %c0_19, %c0_20], %29 {strides = array<i32>} : memref<1x16x32xf32, #tpu.memory_space<vmem>>, vector<1x16x32xf32>,
    return
  }
  func.func @transform_0(%arg0: i32) -> (i32, i32, i32) {
    %c0_i32 = arith.constant 0 : i32
    %c0_i32_0 = arith.constant 0 : i32
    %c0_i32_1 = arith.constant 0 : i32
    return %arg0, %c0_i32, %c0_i32_0 : i32, i32, i32
  }
  func.func @transform_1(%arg0: i32) -> (i32, i32, i32) {
    %c0_i32 = arith.constant 0 : i32
    %c0_i32_0 = arith.constant 0 : i32
    %c0_i32_1 = arith.constant 0 : i32
    return %arg0, %c0_i32, %c0_i32_0 : i32, i32, i32
  }
  func.func @transform_2(%arg0: i32) -> (i32, i32) {
    %c0_i32 = arith.constant 0 : i32
    %c0_i32_0 = arith.constant 0 : i32
    %c0_i32_1 = arith.constant 0 : i32
    return %c0_i32, %c0_i32_0 : i32, i32
  }
  func.func @transform_3(%arg0: i32) -> (i32, i32) {
    %c0_i32 = arith.constant 0 : i32
    %c0_i32_0 = arith.constant 0 : i32
    %c0_i32_1 = arith.constant 0 : i32
    return %c0_i32, %c0_i32_0 : i32, i32
  }
  func.func @transform_4(%arg0: i32) -> (i32, i32) {
    %c0_i32 = arith.constant 0 : i32
    %c0_i32_0 = arith.constant 0 : i32
    %c0_i32_1 = arith.constant 0 : i32
    return %c0_i32, %c0_i32_0 : i32, i32
  }
  func.func @transform_5(%arg0: i32) -> (i32, i32) {
    %c0_i32 = arith.constant 0 : i32
    %c0_i32_0 = arith.constant 0 : i32
    %c0_i32_1 = arith.constant 0 : i32
    return %c0_i32, %c0_i32_0 : i32, i32
  }
  func.func @transform_6(%arg0: i32) -> (i32, i32, i32) {
    %c0_i32 = arith.constant 0 : i32
    %c0_i32_0 = arith.constant 0 : i32
    %c0_i32_1 = arith.constant 0 : i32
    return %arg0, %c0_i32, %c0_i32_0 : i32, i32, i32
  }
}

</mosaic_0001>

<bundles_post_ra>
// kernel: tpu_custom_call.1
= control target key start
LH: loop header
LB: loop body
LE: loop exit
PB: predicated region body
PF: predicated region fallthrough
CT: control target
= control target key end

     0   :  { %11 = vsyncpa [#allocation3], 0  ;;  %s873_s0 = inlined_call_operand.hbm [shape: f32[1,16,32], index: 0, kind: input, shape index: {}]   ;;  %s874_s1 = inlined_call_operand.hbm [shape: f32[1,16,32], index: 1, kind: input, shape index: {}]   ;;  %s875_s2 = inlined_call_operand.hbm [shape: f32[32,32], index: 2, kind: input, shape index: {}]   ;;  %s876_s3 = inlined_call_operand.vmem [shape: f32[1,32], index: 3, kind: input, shape index: {}]   ;;  %s877_s4 = inlined_call_operand.hbm [shape: f32[32,64], index: 4, kind: input, shape index: {}]   ;;  %s878_s5 = inlined_call_operand.vmem [shape: f32[1,64], index: 5, kind: input, shape index: {}]   ;;  %s879_s6 = inlined_call_operand.hbm [shape: f32[1,16,32], index: 6, kind: output, shape index: {}]  }
   0x1   :  { %12 = vsyncpa [#allocation6], 0 }
   0x2   :  { %13 = vsyncpa [#allocation9], 0 }
   0x3   :  { %14 = vsyncpa [#allocation4], 0  ;;  %s719_s21 = smov [#allocation5]   ;;  %s720_s23 = smov [#allocation2]  }
   0x4   :  { %s32_s22 = sshll.u32 %s719_s21, 4  ;;  %s20_s24 = sshll.u32 %s720_s23, 4  ;;  %s33_s22 = int_to_ptr.vmem [resolvable:$true] %s32_s22  ;;  %s762_s24 = int_to_ptr.vmem [resolvable:$true] %s20_s24 }
   0x5   :  { %s601_s27 = scalar_lea.hbm %s874_s1, 256 }
   0x6   :  { %p602_p0 = scmp.ne.s32.totalorder %s874_s1, %s601_s27  ;;  %p605_p1 = scmp.lt.u32.totalorder %s601_s27, %s874_s1 }
   0x8   :  { %p607_p2 = pnand %p605_p1, %p602_p0 }
   0xa   :  { %610 = shalt.err (!%p607_p2)
}
   0xb   :  { %s611_s8 = scalar_lea.vmem %s33_s22, 256  ;;  %p616_p4 = scmp.lt.s32.totalorder %s33_s22, %s33_s22 }
   0xc   :  { %p612_p3 = scmp.ne.s32.totalorder %s33_s22, %s611_s8  ;;  %p617_p5 = scmp.lt.s32.totalorder %s611_s8, %s611_s8 }
   0xe   :  { %p618_p6 = por %p617_p5, %p616_p4 }
  0x10   :  { %p619_p7 = pnand %p618_p6, %p612_p3 }
  0x12   :  { %622 = shalt.err (!%p619_p7)
}
  0x13   :  { %s721_s9 = smov 128   ;;  %s722_s10 = smov 8  }
  0x14   :  { %38 = dma.hbm_to_vmem [thread:$0]  %s874_s1, 256, %s33_s22, [#allocation6], %s721_s9, %s721_s9, %s722_s10  }
  0x15   :  { %s623_s15 = scalar_lea.hbm %s873_s0, 256 }
  0x16   :  { %p624_p8 = scmp.ne.s32.totalorder %s873_s0, %s623_s15  ;;  %p627_p9 = scmp.lt.u32.totalorder %s623_s15, %s873_s0 }
  0x18   :  { %p629_p10 = pnand %p627_p9, %p624_p8 }
  0x1a   :  { %632 = shalt.err (!%p629_p10)
}
  0x1b   :  { %s633_s20 = scalar_lea.vmem %s762_s24, 256  ;;  %p638_p12 = scmp.lt.s32.totalorder %s762_s24, %s762_s24 }
  0x1c   :  { %p634_p11 = scmp.ne.s32.totalorder %s762_s24, %s633_s20  ;;  %p639_p13 = scmp.lt.s32.totalorder %s633_s20, %s633_s20 }
  0x1e   :  { %p640_p0 = por %p639_p13, %p638_p12 }
  0x20   :  { %p641_p1 = pnand %p640_p0, %p634_p11 }
  0x22   :  { %644 = shalt.err (!%p641_p1)
}
  0x23   :  { %26 = dma.hbm_to_vmem [thread:$0]  %s873_s0, 256, %s762_s24, [#allocation3], %s721_s9, %s721_s9, %s722_s10  }
  0x24   :  { %s723_s22 = smov [#allocation7]   ;;  %s724_s25 = smov [#allocation8]  }
  0x25   :  { %s44_s23 = sshll.u32 %s723_s22, 4  ;;  %s58_s26 = sshll.u32 %s724_s25, 4  ;;  %s45_s23 = int_to_ptr.vmem [resolvable:$true] %s44_s23  ;;  %s799_s26 = int_to_ptr.vmem [resolvable:$true] %s58_s26 }
  0x26   :  { %s645_s29 = scalar_lea.hbm %s875_s2, 512 }
  0x27   :  { %p646_p2 = scmp.ne.s32.totalorder %s875_s2, %s645_s29  ;;  %p649_p3 = scmp.lt.u32.totalorder %s645_s29, %s875_s2 }
  0x29   :  { %p651_p4 = pnand %p649_p3, %p646_p2 }
  0x2b   :  { %654 = shalt.err (!%p651_p4)
}
  0x2c   :  { %s655_s0 = scalar_lea.vmem %s45_s23, 512  ;;  %p660_p6 = scmp.lt.s32.totalorder %s45_s23, %s45_s23 }
  0x2d   :  { %p656_p5 = scmp.ne.s32.totalorder %s45_s23, %s655_s0  ;;  %p661_p7 = scmp.lt.s32.totalorder %s655_s0, %s655_s0 }
  0x2f   :  { %p662_p8 = por %p661_p7, %p660_p6 }
  0x31   :  { %p663_p9 = pnand %p662_p8, %p656_p5 }
  0x33   :  { %666 = shalt.err (!%p663_p9)
}
  0x34   :  { %50 = dma.hbm_to_vmem [thread:$0]  %s875_s2, 512, %s45_s23, [#allocation6], %s721_s9, %s721_s9, %s722_s10  }
  0x35   :  { %s667_s15 = scalar_lea.hbm %s877_s4, 512 }
  0x36   :  { %p668_p10 = scmp.ne.s32.totalorder %s877_s4, %s667_s15  ;;  %p671_p11 = scmp.lt.u32.totalorder %s667_s15, %s877_s4 }
  0x38   :  { %p673_p12 = pnand %p671_p11, %p668_p10 }
  0x3a   :  { %676 = shalt.err (!%p673_p12)
}
  0x3b   :  { %s677_s20 = scalar_lea.vmem %s799_s26, 512  ;;  %p682_p0 = scmp.lt.s32.totalorder %s799_s26, %s799_s26 }
  0x3c   :  { %p678_p13 = scmp.ne.s32.totalorder %s799_s26, %s677_s20  ;;  %p683_p1 = scmp.lt.s32.totalorder %s677_s20, %s677_s20 }
  0x3e   :  { %p684_p2 = por %p683_p1, %p682_p0 }
  0x40   :  { %p685_p3 = pnand %p684_p2, %p678_p13 }
  0x42   :  { %688 = shalt.err (!%p685_p3)
}
  0x43   :  { %64 = dma.hbm_to_vmem [thread:$0]  %s877_s4, 512, %s799_s26, [#allocation9], %s721_s9, %s721_s9, %s722_s10  }
  0x44   :  { %711 = dma.done.wait [#allocation3], 256  }
  0x45   :  { %712 = vsyncadd [#allocation3], 4294967040 }
  0x46   :  { %713 = dma.done.wait [#allocation6], 768  }
  0x47   :  { %714 = vsyncadd [#allocation6], 4294966528 }
  0x48   :  { %715 = dma.done.wait [#allocation9], 512  }
  0x49   :  { %716 = vsyncadd [#allocation9], 4294966784  ;;  %vm94_vm0 = vcmask 261120   ;;  %v176_v0 = vld [vmem:[#allocation8] sm:$0xff]  ;;  %v177_v1 = vld [vmem:[#allocation8 + $0x8] sm:$0xff]  ;;  %s725_s25 = smov 96  }
  0x4a   :  { %v178_v2 = vld [vmem:[#allocation8 + $0x10] sm:$0xff]  ;;  %v562_v3 = vpack.c.bf16 %v177_v1, %v176_v0  ;;  %v179_v4 = vld [vmem:[#allocation8 + $0x18] sm:$0xff]  ;;  %v83_v6 = vld [vmem:[#allocation7] sm:$0xff]  ;;  %vm355_vm2 = vcmask 130048  }
  0x4b   :  { %v81_v5 = vld [vmem:[#allocation5] sm:$0xff]  ;;  %v566_v7 = vpack.c.bf16 %v179_v4, %v178_v2  ;;  %v84_v8 = vld [vmem:[#allocation7 + $0x8] sm:$0xff]  ;;  %v86_v11 = vld [vmem:[#allocation7 + $0x18] sm:$0xff] }
  0x4c   :  { %537 = vmatprep.mubr.msk.f32.mxu1 %vm94_vm0, %v81_v5  ;;  %v85_v9 = vld [vmem:[#allocation7 + $0x10] sm:$0xff]  ;;  %563 = vmatprep.subr.bf16.mxu1 %v562_v3  ;;  %v554_v10 = vpack.c.bf16 %v84_v8, %v83_v6  ;;  %v79_v12 = vld [vmem:[#allocation2] sm:$0xff]  ;;  %v82_v14 = vld [vmem:[#allocation5 + $0x8] sm:$0xff] }
  0x4d   :  { %565 = vmatpush3.bf16.msra.mxu1 %v562_v3  ;;  %v558_v13 = vpack.c.bf16 %v86_v11, %v85_v9  ;;  %526 = vmatprep.mubr.msk.f32.mxu0 %vm94_vm0, %v79_v12  ;;  %v80_v15 = vld [vmem:[#allocation2 + $0x8] sm:$0xff]  ;;  %v489_v16 = vld [vmem:[%s878_s5] ss:$0 sm:$0xff]  ;;  %vm571_vm1 = vmpackc.low %vm94_vm0, %vm94_vm0 }
  0x4e   :  { %567 = vmatprep.subr.bf16.mxu1 %v566_v7  ;;  %555 = vmatprep.subr.bf16.mxu0 %v554_v10  ;;  %v486_v20 = vld [vmem:[%s876_s3] ss:$0 sm:$0xff]  ;;  %s726_s3 = smov [#allocation10]  }
  0x4f   :  { %557 = vmatpush3.bf16.msra.mxu0 %v554_v10  ;;  %s472_s5 = sshll.u32 %s726_s3, 4  ;;  %s473_s5 = int_to_ptr.vmem [resolvable:$true] %s472_s5 }
  0x50   :  { %559 = vmatprep.subr.bf16.mxu0 %v558_v13  ;;  %s689_s26 = scalar_lea.vmem %s473_s5, 256  ;;  %p694_p5 = scmp.lt.s32.totalorder %s473_s5, %s473_s5 }
  0x51   :  { %569 = vmatpush3.bf16.msra.mxu1 %v566_v7  ;;  %p690_p4 = scmp.ne.s32.totalorder %s473_s5, %s689_s26  ;;  %p695_p6 = scmp.lt.s32.totalorder %s689_s26, %s689_s26 }
  0x53   :  { %561 = vmatpush3.bf16.msra.mxu0 %v558_v13  ;;  %p696_p7 = por %p695_p6, %p694_p5 }
  0x54   :  { %538 = vmatmul.mubr.msk.f32.vlgmr.msra.gmra.mrb[0].mxu1 %vm94_vm0, %v82_v14 }
  0x55   :  { %p697_p8 = pnand %p696_p7, %p690_p4 }
  0x56   :  { %527 = vmatmul.mubr.msk.f32.vlgmr.msra.gmra.mrb[0].mxu0 %vm94_vm0, %v80_v15 }
 0x127   :  { %v539_v17 = vpop.f32.mrb[0].mxu1 }
 0x128   :  { %v265_v18 = vadd.f32 %v539_v17, %v489_v16  ;;  %v259_v19 = vpop.f32.mrb[1].mxu1 }
 0x129   :  { %v260_v21 = vadd.f32 %v489_v16, %v259_v19  ;;  %v528_v22 = vpop.f32.mrb[0].mxu0 }
 0x12a   :  { %v167_v23 = vpop.f32.mrb[1].mxu0  ;;  %v173_v27 = vadd.f32 %v528_v22, %v486_v20 }
 0x12b   :  { %v570_v24 = vpack.c.bf16 %v265_v18, %v260_v21  ;;  %v588_v25 = vpack.i.bf16 %v265_v18, %v260_v21  ;;  %v168_v26 = vadd.f32 %v486_v20, %v167_v23 }
 0x12d   :  { %589 = vrot.lane.b32.xlu1 %v588_v25, %s725_s25  ;;  %572 = vmatprep.subr.msk.bf16.mxu0 %vm571_vm1, %v570_v24 }
 0x12e   :  { %575 = vmatpush3.bf16.xpose.msk.msra.mxu0 %vm571_vm1, %v570_v24  ;;  %544 = vmatprep.mubr.msk.f32.mxu0 %vm94_vm0, %v168_v26 }
 0x135   :  { %545 = vmatmul.mubr.msk.f32.vlgmr.msra.gmra.mrb[2].mxu0 %vm94_vm0, %v173_v27 }
 0x19f   :  { %v590_v28 = vpop.permute.xlu1 %589 }
 0x1a0   :  { %v592_v29 = vunpack.i.h.bf16 %v590_v28  ;;  %v591_v30 = vunpack.i.l.bf16 %v590_v28 }
 0x1a2   :  { %v576_v31 = vpack.c.bf16 %v592_v29, %v591_v30 }
 0x1a4   :  { %577 = vmatprep.subr.bf16.mxu1 %v576_v31 }
 0x1a5   :  { %579 = vmatpush3.bf16.msra.mxu1 %v576_v31 }
 0x208   :  { %v546_v32 = vpop.f32.mrb[2].mxu0 }
 0x209   :  { %v346_v33 = vpop.f32.mrb[3].mxu0  ;;  %v359_v35 = vsel %vm355_vm2, %v546_v32, -inf }
 0x20a   :  { %v356_v34 = vsel %vm355_vm2, %v346_v33, -inf }
 0x20b   :  { %357 = vmax.xlane.f32.xlu0 %v356_v34 }
 0x20f   :  { %360 = vmax.xlane.f32.xlu0 %v359_v35 }
 0x298   :  { %v358_v36 = vpop.xlane.xlu0 %357 }
 0x299   :  { %v362_v37 = vsub.f32 %v346_v33, %v358_v36 }
 0x29b   :  { %v364_v38 = vmul.f32 1.442695, %v362_v37 }
 0x29c   :  { %v361_v39 = vpop.xlane.xlu0 %360 }
 0x29d   :  { %593 = vpow2.f32 %v364_v38  ;;  %v363_v40 = vsub.f32 %v546_v32, %v361_v39 }
 0x29f   :  { %v366_v41 = vmul.f32 1.442695, %v363_v40 }
 0x2a1   :  { %595 = vpow2.f32 %v366_v41 }
 0x2a7   :  { %v594_v42 = vpop.eup %593 }
 0x2a8   :  { %551 = vmatprep.mubr.msk.f32.mxu1 %vm355_vm2, %v594_v42  ;;  %v368_v43 = vsel %vm355_vm2, %v594_v42, 0.0 }
 0x2a9   :  { %369 = vadd.xlane.f32.xlu1 %v368_v43 }
 0x2ab   :  { %v596_v44 = vpop.eup %595 }
 0x2ac   :  { %552 = vmatmul.mubr.msk.f32.vlgmr.msra.gmra.mrb[2].mxu1 %vm355_vm2, %v596_v44  ;;  %v371_v45 = vsel %vm355_vm2, %v596_v44, 0.0 }
 0x2ad   :  { %372 = vadd.xlane.f32.xlu0 %v371_v45 }
 0x336   :  { %v370_v47 = vpop.xlane.xlu1 %369 }
 0x33a   :  { %v373_v46 = vpop.xlane.xlu0 %372 }
 0x33b   :  { %597 = vrcp.f32 %v373_v46 }
 0x33c   :  { %599 = vrcp.f32 %v370_v47 }
 0x345   :  { %v598_v48 = vpop.eup %597 }
 0x346   :  { %v600_v50 = vpop.eup %599 }
 0x37f   :  { %v553_v49 = vpop.f32.mrb[2].mxu1 }
 0x380   :  { %v464_v51 = vmul.f32 %v598_v48, %v553_v49  ;;  %v452_v52 = vpop.f32.mrb[3].mxu1 }
 0x381   :  { %v463_v53 = vmul.f32 %v600_v50, %v452_v52 }
 0x382   :  { %466 = vst.msk [vmem:[#allocation10 + $0x8] sm:$0xff] %vm94_vm0, %v464_v51 }
 0x383   :  { %465 = vst.msk [vmem:[#allocation10] sm:$0xff] %vm94_vm0, %v463_v53 }
 0x384   :  { %700 = shalt.err (!%p697_p8)
}
 0x385   :  { %s701_s29 = scalar_lea.hbm %s879_s6, 256 }
 0x386   :  { %p702_p9 = scmp.ne.s32.totalorder %s879_s6, %s701_s29  ;;  %p705_p10 = scmp.lt.u32.totalorder %s701_s29, %s879_s6 }
 0x388   :  { %p707_p11 = pnand %p705_p10, %p702_p9 }
 0x38a   :  { %710 = shalt.err (!%p707_p11)
}
 0x38b   :  { %478 = dma.vmem_to_hbm [thread:$0]  %s473_s5, 256, %s879_s6, [#allocation4], %s721_s9, %s721_s9, %s722_s10  }
 0x38c   :  { %717 = dma.done.wait [#allocation4], 256  }
 0x38d   :  { %718 = vsyncadd [#allocation4], 4294967040 }
 0x38e   :  { %482 = vsyncpa [#allocation3], 1 }
 0x38f   :  { %483 = vsyncpa [#allocation6], 1 }
 0x390   :  { %484 = vsyncpa [#allocation9], 1 }
 0x391   :  { %485 = vsyncpa [#allocation4], 1 }

</bundles_post_ra>
